<compile_context>
chip_gen: v5e
topology: v5e:2x2
jax: 0.10.0
libtpu: 0.0.40
codegen_flags: <defaults>
</compile_context>

<pallas_src>
import functools
import math

import jax
import jax.numpy as jnp
from jax.experimental import pallas as pl
from jax.experimental.pallas import tpu as pltpu


def _rangebn_kernel(x_ref, w_ref, b_ref, out_ref, mean_ref, scale_ref, *,
                    num_chunks, chunk, scale_fix, eps):
    # x_ref block: (B, CB, HW)  -- all batches/spatial for CB channels.
    y = x_ref[...]                                  # native dtype
    B, CB, HW = y.shape
    n = B * HW
    inv_chunks = 1.0 / num_chunks

    # ---- per-chunk max / min (torch channel-major flat order) -------------
    # Chunk i covers flat elements [i*chunk, (i+1)*chunk) of the per-channel
    # (batch-major, spatial-minor) flattening.
    if chunk % HW == 0:
        # Each chunk is `rows` whole batch rows: one vectorized lane-reduce
        # over the full tile, then fold rows->chunks on tiny arrays (free
        # leading-dim reshapes, elementwise cross-vreg max/sum).
        rows = chunk // HW                                    # = B // num_chunks
        rmax = jnp.max(y, axis=2, keepdims=True)              # (B, CB, 1)
        rmin = jnp.min(y, axis=2, keepdims=True)              # (B, CB, 1)
        cmax = jnp.max(rmax.reshape(num_chunks, rows, CB, 1), axis=1)  # (nc,CB,1)
        cmin = jnp.min(rmin.reshape(num_chunks, rows, CB, 1), axis=1)
        mean_max = (jnp.sum(cmax.astype(jnp.float32), axis=0, keepdims=True)
                    * inv_chunks)                             # (1, CB, 1)
        mean_min = (jnp.sum(cmin.astype(jnp.float32), axis=0, keepdims=True)
                    * inv_chunks)
    else:
        # Several chunks per batch row (HW % chunk == 0): static lane slices.
        sum_max = jnp.zeros((1, CB, 1), jnp.float32)
        sum_min = jnp.zeros((1, CB, 1), jnp.float32)
        for i in range(num_chunks):
            start = i * chunk
            b0 = start // HW
            h0 = start % HW
            piece = y[b0:b0 + 1, :, h0:h0 + chunk]            # (1, CB, chunk)
            pmax = jnp.max(piece, axis=2, keepdims=True)      # (1, CB, 1)
            pmin = jnp.min(piece, axis=2, keepdims=True)
            sum_max = sum_max + pmax.astype(jnp.float32)
            sum_min = sum_min + pmin.astype(jnp.float32)
        mean_max = sum_max * inv_chunks
        mean_min = sum_min * inv_chunks

    # ---- per-channel mean (f32 accumulation) ------------------------------
    rsum = jnp.sum(y.astype(jnp.float32), axis=2, keepdims=True)       # (B,CB,1)
    mean = jnp.sum(rsum, axis=0, keepdims=True) * (1.0 / n)            # (1,CB,1)

    # Exact division (scale feeds every output element; approx recip would
    # cost accuracy for zero gain -- it's only CB values).
    scale = 1.0 / ((mean_max - mean_min) * scale_fix + eps)            # (1,CB,1)

    gamma = w_ref[...].reshape(1, CB, 1)            # f32, (CB,1) -> (1,CB,1)
    beta = b_ref[...].reshape(1, CB, 1)

    # ---- fused affine:  (y - mean)*scale*gamma + beta  ==  y*a + bfused ----
    a = scale * gamma
    bfused = beta - mean * a

    # Elementwise pass in the input dtype for bf16/f16 (bf16 VALU on v6e/v7x
    # halves vreg pressure); f32 inputs stay f32.
    ew = jnp.float32 if y.dtype == jnp.float32 else y.dtype
    out = y.astype(ew) * a.astype(ew) + bfused.astype(ew)
    out_ref[...] = out.astype(out_ref.dtype)

    mean_ref[...] = mean.reshape(CB, 1)
    scale_ref[...] = scale.reshape(CB, 1)


def range_bn_bfp_forward(x, weight, bias, running_mean, running_var, *,
                         num_chunks=8, momentum=0.1, eps=1e-5,
                         channel_block=None):
    """Returns (out, new_running_mean, new_running_var)."""
    B, C, H, W = x.shape
    HW = H * W
    n = B * HW
    assert n % num_chunks == 0, "B*H*W must be divisible by num_chunks"
    chunk = n // num_chunks
    assert chunk % HW == 0 or HW % chunk == 0, (
        "chunk boundaries must align with batch rows (B % num_chunks == 0) "
        "or subdivide a single batch row (H*W % chunk == 0)")
    # TODO(synk): chunks straddling batch-row boundaries (neither condition)
    # would need an in-kernel relayout or the old channel-major transpose path.

    scale_fix = 1.0 / (2.0 * math.log(chunk)) ** 0.5

    # Free reshapes only -- no transpose, no extra HBM pass.
    x3 = x.reshape(B, C, HW)
    w2 = weight.reshape(C, 1).astype(jnp.float32)
    b2 = bias.reshape(C, 1).astype(jnp.float32)

    itemsize = jnp.dtype(x.dtype).itemsize
    per_channel_bytes = B * HW * itemsize

    if channel_block is None:
        # Largest channel block that (a) satisfies the (8,*) sublane rule
        # (CB == C or CB % 8 == 0) and (b) keeps the double-buffered in+out
        # tiles comfortably inside VMEM.
        budget = 6 * 1024 * 1024
        valid = [cb for cb in range(1, C + 1)
                 if C % cb == 0 and (cb == C or cb % 8 == 0)]
        fitting = [cb for cb in valid if cb * per_channel_bytes <= budget]
        channel_block = max(fitting) if fitting else min(valid)
        # TODO(synk): for very large B*H*W per channel (e.g. early ResNet
        # layers on v7x's 64 MiB VMEM) add a spatial grid axis with a
        # two-pass stats/normalize scheme instead of one giant block.
    CB = channel_block
    assert C % CB == 0 and (CB == C or CB % 8 == 0), "bad channel_block"

    block_bytes = CB * per_channel_bytes
    vmem_limit = int(max(32 * 1024 * 1024, 4 * block_bytes + (2 << 20)))

    kernel = functools.partial(_rangebn_kernel, num_chunks=num_chunks,
                               chunk=chunk, scale_fix=scale_fix, eps=eps)

    cost = pl.CostEstimate(
        flops=6 * B * C * HW,
        transcendentals=0,
        bytes_accessed=2 * B * C * HW * itemsize + 4 * C * 4,
    )

    out3, mean, scale = pl.pallas_call(
        kernel,
        out_shape=(
            jax.ShapeDtypeStruct((B, C, HW), x.dtype),
            jax.ShapeDtypeStruct((C, 1), jnp.float32),
            jax.ShapeDtypeStruct((C, 1), jnp.float32),
        ),
        grid=(C // CB,),
        in_specs=[
            pl.BlockSpec((B, CB, HW), lambda c: (0, c, 0)),   # x (NCHW order)
            pl.BlockSpec((CB, 1), lambda c: (c, 0)),          # weight
            pl.BlockSpec((CB, 1), lambda c: (c, 0)),          # bias
        ],
        out_specs=(
            pl.BlockSpec((B, CB, HW), lambda c: (0, c, 0)),   # out (NCHW order)
            pl.BlockSpec((CB, 1), lambda c: (c, 0)),          # per-channel mean
            pl.BlockSpec((CB, 1), lambda c: (c, 0)),          # per-channel scale
        ),
        compiler_params=pltpu.CompilerParams(
            dimension_semantics=("parallel",),
            vmem_limit_bytes=vmem_limit),
        cost_estimate=cost,
    )(x3, w2, b2)

    out = out3.reshape(B, C, H, W)
    mean = mean.reshape(C)
    scale = scale.reshape(C)

    # Running-buffer EMA side effects of the torch module (returned, not
    # mutated).  Mirrors the module exactly: running_var tracks the reciprocal
    # range scale and the EMA is old*momentum + new*(1-momentum).
    new_running_mean = running_mean * momentum + mean * (1.0 - momentum)
    new_running_var = running_var * momentum + scale * (1.0 - momentum)
    return out, new_running_mean, new_running_var


def _reference(x, weight, bias, num_chunks, eps):
    B, C, H, W = x.shape
    y = jnp.transpose(x, (1, 0, 2, 3)).reshape(C, num_chunks, -1)
    mean_max = y.max(-1).mean(-1)
    mean_min = y.min(-1).mean(-1)
    mean = y.reshape(C, -1).mean(-1)
    scale_fix = 1.0 / (2.0 * math.log(y.shape[-1])) ** 0.5
    scale = 1.0 / ((mean_max - mean_min) * scale_fix + eps)
    out = (x - mean.reshape(1, C, 1, 1)) * scale.reshape(1, C, 1, 1)
    out = out * weight.reshape(1, C, 1, 1) + bias.reshape(1, C, 1, 1)
    return out, mean, scale


if __name__ == "__main__":
    # NOTE: bfp_conf.fi / bfp_conf.fw branches in the torch module are no-ops
    # (both branches select the same tensors), so they are omitted here.
    key = jax.random.PRNGKey(0)
    eps = 1e-5
    momentum = 0.1

    def run_case(B, C, H, W, num_chunks, channel_block=None):
        kx, kw = jax.random.split(jax.random.fold_in(key, B * 1000 + C))
        x = jax.random.normal(kx, (B, C, H, W), dtype=jnp.float32)
        # reset_params(): weight ~ uniform[0,1), bias = 0; running buffers = 0
        weight = jax.random.uniform(kw, (C,), dtype=jnp.float32)
        bias = jnp.zeros((C,), jnp.float32)
        rm = jnp.zeros((C,), jnp.float32)
        rv = jnp.zeros((C,), jnp.float32)

        out, nrm, nrv = range_bn_bfp_forward(
            x, weight, bias, rm, rv, num_chunks=num_chunks,
            momentum=momentum, eps=eps, channel_block=channel_block)
        jax.block_until_ready(out)

        ref_out, ref_mean, ref_scale = _reference(x, weight, bias, num_chunks, eps)
        ref_rm = rm * momentum + ref_mean * (1.0 - momentum)
        ref_rv = rv * momentum + ref_scale * (1.0 - momentum)
        assert jnp.allclose(out, ref_out, atol=1e-4, rtol=1e-4), "output mismatch"
        assert jnp.allclose(nrm, ref_rm, atol=1e-4, rtol=1e-4), "running_mean mismatch"
        assert jnp.allclose(nrv, ref_rv, atol=1e-4, rtol=1e-4), "running_var mismatch"

    # Case 1: chunks subdivide a batch row (H*W % chunk == 0), single grid step
    # (exercises the static-slice chunk path).
    run_case(2, 4, 16, 16, num_chunks=8)
    # Case 2: chunks align to batch rows (B % num_chunks == 0), 2 grid steps
    # with CB=8 channels per step (exercises the vectorized row-chunk path and
    # the channel-blocked index map).
    run_case(8, 16, 8, 8, num_chunks=8, channel_block=8)

    print("KERNEL_OK")
</pallas_src>

<mosaic_0001>
module attributes {stable_mosaic.version = 11 : i64} {
  func.func @_rangebn_kernel(%arg0: i32, %arg1: memref<2x4x256xf32, #tpu.memory_space<vmem>>, %arg2: memref<4x1xf32, #tpu.memory_space<vmem>>, %arg3: memref<4x1xf32, #tpu.memory_space<vmem>>, %arg4: memref<2x4x256xf32, #tpu.memory_space<vmem>>, %arg5: memref<4x1xf32, #tpu.memory_space<vmem>>, %arg6: memref<4x1xf32, #tpu.memory_space<vmem>>) attributes {dimension_semantics = [#tpu.dimension_semantics<parallel>], iteration_bounds = array<i64: 1>, scalar_prefetch = 0 : i64, scratch_operands = 0 : i64, tpu.core_type = #tpu.core_type<tc>, window_params = [{transform_indices = @transform_0, window_bounds = array<i64: 2, 4, 256>}, {transform_indices = @transform_1, window_bounds = array<i64: 4, 1>}, {transform_indices = @transform_2, window_bounds = array<i64: 4, 1>}, {transform_indices = @transform_3, window_bounds = array<i64: 2, 4, 256>}, {transform_indices = @transform_4, window_bounds = array<i64: 4, 1>}, {transform_indices = @transform_5, window_bounds = array<i64: 4, 1>}]} {
    %c0 = arith.constant 0 : index
    %c0_0 = arith.constant 0 : index
    %c0_1 = arith.constant 0 : index
    %0 = vector.load %arg1[%c0, %c0_0, %c0_1] : memref<2x4x256xf32, #tpu.memory_space<vmem>>, vector<2x4x256xf32>
    %cst = arith.constant 0.000000e+00 : f32
    %1 = vector.broadcast %cst : f32 to vector<1x4x1xf32>
    %cst_2 = arith.constant 0.000000e+00 : f32
    %2 = vector.broadcast %cst_2 : f32 to vector<1x4x1xf32>
    %3 = vector.extract_strided_slice %0 {offsets = [0, 0, 0], sizes = [1, 4, 64], strides = [1, 1, 1]} : vector<2x4x256xf32> to vector<1x4x64xf32>
    %cst_3 = arith.constant dense<0xFF800000> : vector<1x4xf32>
    %4 = vector.multi_reduction <maximumf>, %3, %cst_3 [2] : vector<1x4x64xf32> to vector<1x4xf32>
    %5 = vector.shape_cast %4 : vector<1x4xf32> to vector<1x4x1xf32>
    %cst_4 = arith.constant dense<0x7F800000> : vector<1x4xf32>
    %6 = vector.multi_reduction <minimumf>, %3, %cst_4 [2] : vector<1x4x64xf32> to vector<1x4xf32>
    %7 = vector.shape_cast %6 : vector<1x4xf32> to vector<1x4x1xf32>
    %8 = arith.addf %1, %5 : vector<1x4x1xf32>
    %9 = arith.addf %2, %7 : vector<1x4x1xf32>
    %10 = vector.extract_strided_slice %0 {offsets = [0, 0, 64], sizes = [1, 4, 64], strides = [1, 1, 1]} : vector<2x4x256xf32> to vector<1x4x64xf32>
    %cst_5 = arith.constant dense<0xFF800000> : vector<1x4xf32>
    %11 = vector.multi_reduction <maximumf>, %10, %cst_5 [2] : vector<1x4x64xf32> to vector<1x4xf32>
    %12 = vector.shape_cast %11 : vector<1x4xf32> to vector<1x4x1xf32>
    %cst_6 = arith.constant dense<0x7F800000> : vector<1x4xf32>
    %13 = vector.multi_reduction <minimumf>, %10, %cst_6 [2] : vector<1x4x64xf32> to vector<1x4xf32>
    %14 = vector.shape_cast %13 : vector<1x4xf32> to vector<1x4x1xf32>
    %15 = arith.addf %8, %12 : vector<1x4x1xf32>
    %16 = arith.addf %9, %14 : vector<1x4x1xf32>
    %17 = vector.extract_strided_slice %0 {offsets = [0, 0, 128], sizes = [1, 4, 64], strides = [1, 1, 1]} : vector<2x4x256xf32> to vector<1x4x64xf32>
    %cst_7 = arith.constant dense<0xFF800000> : vector<1x4xf32>
    %18 = vector.multi_reduction <maximumf>, %17, %cst_7 [2] : vector<1x4x64xf32> to vector<1x4xf32>
    %19 = vector.shape_cast %18 : vector<1x4xf32> to vector<1x4x1xf32>
    %cst_8 = arith.constant dense<0x7F800000> : vector<1x4xf32>
    %20 = vector.multi_reduction <minimumf>, %17, %cst_8 [2] : vector<1x4x64xf32> to vector<1x4xf32>
    %21 = vector.shape_cast %20 : vector<1x4xf32> to vector<1x4x1xf32>
    %22 = arith.addf %15, %19 : vector<1x4x1xf32>
    %23 = arith.addf %16, %21 : vector<1x4x1xf32>
    %24 = vector.extract_strided_slice %0 {offsets = [0, 0, 192], sizes = [1, 4, 64], strides = [1, 1, 1]} : vector<2x4x256xf32> to vector<1x4x64xf32>
    %cst_9 = arith.constant dense<0xFF800000> : vector<1x4xf32>
    %25 = vector.multi_reduction <maximumf>, %24, %cst_9 [2] : vector<1x4x64xf32> to vector<1x4xf32>
    %26 = vector.shape_cast %25 : vector<1x4xf32> to vector<1x4x1xf32>
    %cst_10 = arith.constant dense<0x7F800000> : vector<1x4xf32>
    %27 = vector.multi_reduction <minimumf>, %24, %cst_10 [2] : vector<1x4x64xf32> to vector<1x4xf32>
    %28 = vector.shape_cast %27 : vector<1x4xf32> to vector<1x4x1xf32>
    %29 = arith.addf %22, %26 : vector<1x4x1xf32>
    %30 = arith.addf %23, %28 : vector<1x4x1xf32>
    %31 = vector.extract_strided_slice %0 {offsets = [1, 0, 0], sizes = [1, 4, 64], strides = [1, 1, 1]} : vector<2x4x256xf32> to vector<1x4x64xf32>
    %cst_11 = arith.constant dense<0xFF800000> : vector<1x4xf32>
    %32 = vector.multi_reduction <maximumf>, %31, %cst_11 [2] : vector<1x4x64xf32> to vector<1x4xf32>
    %33 = vector.shape_cast %32 : vector<1x4xf32> to vector<1x4x1xf32>
    %cst_12 = arith.constant dense<0x7F800000> : vector<1x4xf32>
    %34 = vector.multi_reduction <minimumf>, %31, %cst_12 [2] : vector<1x4x64xf32> to vector<1x4xf32>
    %35 = vector.shape_cast %34 : vector<1x4xf32> to vector<1x4x1xf32>
    %36 = arith.addf %29, %33 : vector<1x4x1xf32>
    %37 = arith.addf %30, %35 : vector<1x4x1xf32>
    %38 = vector.extract_strided_slice %0 {offsets = [1, 0, 64], sizes = [1, 4, 64], strides = [1, 1, 1]} : vector<2x4x256xf32> to vector<1x4x64xf32>
    %cst_13 = arith.constant dense<0xFF800000> : vector<1x4xf32>
    %39 = vector.multi_reduction <maximumf>, %38, %cst_13 [2] : vector<1x4x64xf32> to vector<1x4xf32>
    %40 = vector.shape_cast %39 : vector<1x4xf32> to vector<1x4x1xf32>
    %cst_14 = arith.constant dense<0x7F800000> : vector<1x4xf32>
    %41 = vector.multi_reduction <minimumf>, %38, %cst_14 [2] : vector<1x4x64xf32> to vector<1x4xf32>
    %42 = vector.shape_cast %41 : vector<1x4xf32> to vector<1x4x1xf32>
    %43 = arith.addf %36, %40 : vector<1x4x1xf32>
    %44 = arith.addf %37, %42 : vector<1x4x1xf32>
    %45 = vector.extract_strided_slice %0 {offsets = [1, 0, 128], sizes = [1, 4, 64], strides = [1, 1, 1]} : vector<2x4x256xf32> to vector<1x4x64xf32>
    %cst_15 = arith.constant dense<0xFF800000> : vector<1x4xf32>
    %46 = vector.multi_reduction <maximumf>, %45, %cst_15 [2] : vector<1x4x64xf32> to vector<1x4xf32>
    %47 = vector.shape_cast %46 : vector<1x4xf32> to vector<1x4x1xf32>
    %cst_16 = arith.constant dense<0x7F800000> : vector<1x4xf32>
    %48 = vector.multi_reduction <minimumf>, %45, %cst_16 [2] : vector<1x4x64xf32> to vector<1x4xf32>
    %49 = vector.shape_cast %48 : vector<1x4xf32> to vector<1x4x1xf32>
    %50 = arith.addf %43, %47 : vector<1x4x1xf32>
    %51 = arith.addf %44, %49 : vector<1x4x1xf32>
    %52 = vector.extract_strided_slice %0 {offsets = [1, 0, 192], sizes = [1, 4, 64], strides = [1, 1, 1]} : vector<2x4x256xf32> to vector<1x4x64xf32>
    %cst_17 = arith.constant dense<0xFF800000> : vector<1x4xf32>
    %53 = vector.multi_reduction <maximumf>, %52, %cst_17 [2] : vector<1x4x64xf32> to vector<1x4xf32>
    %54 = vector.shape_cast %53 : vector<1x4xf32> to vector<1x4x1xf32>
    %cst_18 = arith.constant dense<0x7F800000> : vector<1x4xf32>
    %55 = vector.multi_reduction <minimumf>, %52, %cst_18 [2] : vector<1x4x64xf32> to vector<1x4xf32>
    %56 = vector.shape_cast %55 : vector<1x4xf32> to vector<1x4x1xf32>
    %57 = arith.addf %50, %54 : vector<1x4x1xf32>
    %58 = arith.addf %51, %56 : vector<1x4x1xf32>
    %cst_19 = arith.constant 1.250000e-01 : f32
    %59 = vector.broadcast %cst_19 : f32 to vector<1x4x1xf32>
    %60 = arith.mulf %57, %59 : vector<1x4x1xf32>
    %cst_20 = arith.constant 1.250000e-01 : f32
    %61 = vector.broadcast %cst_20 : f32 to vector<1x4x1xf32>
    %62 = arith.mulf %58, %61 : vector<1x4x1xf32>
    %cst_21 = arith.constant dense<0.000000e+00> : vector<2x4xf32>
    %63 = vector.multi_reduction <add>, %0, %cst_21 [2] : vector<2x4x256xf32> to vector<2x4xf32>
    %64 = vector.shape_cast %63 : vector<2x4xf32> to vector<2x4x1xf32>
    %cst_22 = arith.constant dense<0.000000e+00> : vector<4x1xf32>
    %65 = vector.multi_reduction <add>, %64, %cst_22 [0] : vector<2x4x1xf32> to vector<4x1xf32>
    %66 = vector.shape_cast %65 : vector<4x1xf32> to vector<1x4x1xf32>
    %cst_23 = arith.constant 0.001953125 : f32
    %67 = vector.broadcast %cst_23 : f32 to vector<1x4x1xf32>
    %68 = arith.mulf %66, %67 : vector<1x4x1xf32>
    %69 = arith.subf %60, %62 : vector<1x4x1xf32>
    %cst_24 = arith.constant 0.346734166 : f32
    %70 = vector.broadcast %cst_24 : f32 to vector<1x4x1xf32>
    %71 = arith.mulf %69, %70 : vector<1x4x1xf32>
    %cst_25 = arith.constant 9.99999974E-6 : f32
    %72 = vector.broadcast %cst_25 : f32 to vector<1x4x1xf32>
    %73 = arith.addf %71, %72 : vector<1x4x1xf32>
    %cst_26 = arith.constant 1.000000e+00 : f32
    %74 = vector.broadcast %cst_26 : f32 to vector<1x4x1xf32>
    %75 = arith.divf %74, %73 : vector<1x4x1xf32>
    %c0_27 = arith.constant 0 : index
    %c0_28 = arith.constant 0 : index
    %76 = vector.load %arg2[%c0_27, %c0_28] : memref<4x1xf32, #tpu.memory_space<vmem>>, vector<4x1xf32>
    %77 = vector.shape_cast %76 : vector<4x1xf32> to vector<1x4x1xf32>
    %c0_29 = arith.constant 0 : index
    %c0_30 = arith.constant 0 : index
    %78 = vector.load %arg3[%c0_29, %c0_30] : memref<4x1xf32, #tpu.memory_space<vmem>>, vector<4x1xf32>
    %79 = vector.shape_cast %78 : vector<4x1xf32> to vector<1x4x1xf32>
    %80 = arith.mulf %75, %77 : vector<1x4x1xf32>
    %81 = arith.mulf %68, %80 : vector<1x4x1xf32>
    %82 = arith.subf %79, %81 : vector<1x4x1xf32>
    %83 = vector.broadcast %80 : vector<1x4x1xf32> to vector<2x4x256xf32>
    %84 = arith.mulf %0, %83 : vector<2x4x256xf32>
    %85 = vector.broadcast %82 : vector<1x4x1xf32> to vector<2x4x256xf32>
    %86 = arith.addf %84, %85 : vector<2x4x256xf32>
    %c0_31 = arith.constant 0 : index
    %c0_32 = arith.constant 0 : index
    %c0_33 = arith.constant 0 : index
    %87 = vector.load %arg4[%c0_31, %c0_32, %c0_33] : memref<2x4x256xf32, #tpu.memory_space<vmem>>, vector<2x4x256xf32>
    tpu.vector_store %arg4[%c0_31, %c0_32, %c0_33], %86 {strides = array<i32>} : memref<2x4x256xf32, #tpu.memory_space<vmem>>, vector<2x4x256xf32>,
    %88 = vector.shape_cast %68 : vector<1x4x1xf32> to vector<4x1xf32>
    %c0_34 = arith.constant 0 : index
    %c0_35 = arith.constant 0 : index
    %89 = vector.load %arg5[%c0_34, %c0_35] : memref<4x1xf32, #tpu.memory_space<vmem>>, vector<4x1xf32>
    tpu.vector_store %arg5[%c0_34, %c0_35], %88 {strides = array<i32>} : memref<4x1xf32, #tpu.memory_space<vmem>>, vector<4x1xf32>,
    %90 = vector.shape_cast %75 : vector<1x4x1xf32> to vector<4x1xf32>
    %c0_36 = arith.constant 0 : index
    %c0_37 = arith.constant 0 : index
    %91 = vector.load %arg6[%c0_36, %c0_37] : memref<4x1xf32, #tpu.memory_space<vmem>>, vector<4x1xf32>
    tpu.vector_store %arg6[%c0_36, %c0_37], %90 {strides = array<i32>} : memref<4x1xf32, #tpu.memory_space<vmem>>, vector<4x1xf32>,
    return
  }
  func.func @transform_0(%arg0: i32) -> (i32, i32, i32) {
    %c0_i32 = arith.constant 0 : i32
    %c0_i32_0 = arith.constant 0 : i32
    %c0_i32_1 = arith.constant 0 : i32
    return %c0_i32, %arg0, %c0_i32_0 : i32, i32, i32
  }
  func.func @transform_1(%arg0: i32) -> (i32, i32) {
    %c0_i32 = arith.constant 0 : i32
    %c0_i32_0 = arith.constant 0 : i32
    return %arg0, %c0_i32 : i32, i32
  }
  func.func @transform_2(%arg0: i32) -> (i32, i32) {
    %c0_i32 = arith.constant 0 : i32
    %c0_i32_0 = arith.constant 0 : i32
    return %arg0, %c0_i32 : i32, i32
  }
  func.func @transform_3(%arg0: i32) -> (i32, i32, i32) {
    %c0_i32 = arith.constant 0 : i32
    %c0_i32_0 = arith.constant 0 : i32
    %c0_i32_1 = arith.constant 0 : i32
    return %c0_i32, %arg0, %c0_i32_0 : i32, i32, i32
  }
  func.func @transform_4(%arg0: i32) -> (i32, i32) {
    %c0_i32 = arith.constant 0 : i32
    %c0_i32_0 = arith.constant 0 : i32
    return %arg0, %c0_i32 : i32, i32
  }
  func.func @transform_5(%arg0: i32) -> (i32, i32) {
    %c0_i32 = arith.constant 0 : i32
    %c0_i32_0 = arith.constant 0 : i32
    return %arg0, %c0_i32 : i32, i32
  }
}

</mosaic_0001>

<bundles_post_ra>
// kernel: tpu_custom_call.1
= control target key start
LH: loop header
LB: loop body
LE: loop exit
PB: predicated region body
PF: predicated region fallthrough
CT: control target
= control target key end

     0   :  { %11 = vsyncpa [#allocation3], 0  ;;  %s409_s0 = inlined_call_operand.hbm [shape: f32[2,4,256], index: 0, kind: input, shape index: {}]   ;;  %s410_s1 = inlined_call_operand.vmem [shape: f32[4,1], index: 1, kind: input, shape index: {}]   ;;  %s411_s2 = inlined_call_operand.vmem [shape: f32[4,1], index: 2, kind: input, shape index: {}]   ;;  %s412_s3 = inlined_call_operand.hbm [shape: f32[2,4,256], index: 3, kind: output, shape index: {0}]   ;;  %s413_s4 = inlined_call_operand.vmem [shape: f32[4,1], index: 4, kind: output, shape index: {1}]   ;;  %s414_s5 = inlined_call_operand.vmem [shape: f32[4,1], index: 5, kind: output, shape index: {2}]  }
   0x1   :  { %12 = vsyncpa [#allocation4], 0  ;;  %s17_s20 = sshll.u32 %s409_s0, 4  ;;  %s304_s21 = smov [#allocation2]   ;;  %s18_s20 = int_to_ptr.hbm [resolvable:$true] %s17_s20 }
   0x2   :  { %s19_s22 = sshll.u32 %s304_s21, 4  ;;  %s305_s23 = smov 128   ;;  %s20_s22 = int_to_ptr.vmem [resolvable:$true] %s19_s22 }
   0x3   :  { %s306_s24 = smov 8  }
   0x4   :  { %25 = dma.hbm_to_vmem [thread:$0]  %s18_s20, 256, %s20_s22, [#allocation3], %s305_s23, %s305_s23, %s306_s24  }
   0x5   :  { %300 = dma.done.wait [#allocation3], 256  }
   0x6   :  { %301 = vsyncadd [#allocation3], 4294967040  ;;  %v347_v0 = vld [vmem:[#allocation2] sm:$0xff]  ;;  %v350_v1 = vld [vmem:[#allocation2 + $0x8] sm:$0xff]  ;;  %s307_s0 = smov 64   ;;  %vm36_vm0 = vcmask 519168  }
   0x7   :  { %55 = vst [vmem:[#allocation1] ss:$2 sm:$0xff] %v347_v0  ;;  %v37_v6 = vsel %vm36_vm0, %v347_v0, -inf  ;;  %v40_v8 = vsel %vm36_vm0, %v347_v0, inf  ;;  %vm45_vm1 = vcmask 1043968   ;;  %v87_v15 = vsel %vm36_vm0, %v350_v1, -inf }
   0x8   :  { %142 = vst [vmem:[#allocation1 + $0x10] ss:$2 sm:$0xff] %v350_v1  ;;  %38 = vmax.xlane.f32.xlu2 %v37_v6  ;;  %v46_v14 = vsel %vm45_vm1, %v347_v0, -inf  ;;  %v90_v16 = vsel %vm36_vm0, %v350_v1, inf  ;;  %v49_v18 = vsel %vm45_vm1, %v347_v0, inf  ;;  %v95_v19 = vsel %vm45_vm1, %v350_v1, -inf }
   0x9   :  { %v98_v20 = vsel %vm45_vm1, %v350_v1, inf  ;;  %vm149_vm2 = vcmask 1043456   ;;  %vm211_vm3 = vcmask 3072  }
   0xe   :  { %v56_v2 = vld.sshfl [vmem:[#allocation1 + $0x8] sm:$0xff pattern:$0x75316420] }
   0xf   :  { %61 = vst [vmem:[#allocation1] ss:$2 sm:$0xff] %v347_v0  ;;  %v58_v10 = vsel %vm36_vm0, %v56_v2, -inf  ;;  %v143_v32 = vld.sshfl [vmem:[#allocation1 + $0x10] sm:$0xff pattern:$0x75316420] }
  0x10   :  { %41 = vmin.xlane.f32.xlu2 %v40_v8  ;;  %v144_v33 = vld.sshfl [vmem:[#allocation1 + $0x18] sm:$0xff pattern:$0x75316420]  ;;  %v155_v35 = vsel %vm149_vm2, %v143_v32, 0.0  ;;  %v183_v32 = vld [vmem:[%s411_s2] sm:$0xf] }
  0x11   :  { %v156_v36 = vsel %vm149_vm2, %v144_v33, 0.0  ;;  %s220_s2 = sshll.u32 %s412_s3, 4  ;;  %s221_s2 = int_to_ptr.hbm [resolvable:$true] %s220_s2 }
  0x12   :  { %v157_v37 = vadd.f32 %v156_v36, %v155_v35  ;;  %v309_v35 = vmov 839922192  }
  0x13   :  { %v192_v36 = vunpack.c.l.s4 %v309_v35 }
  0x16   :  { %v62_v3 = vld.sshfl [vmem:[#allocation1 + $0x8] sm:$0xff pattern:$0x75316420] }
  0x17   :  { %69 = vst [vmem:[#allocation1] ss:$2 sm:$0xff] %v347_v0  ;;  %v64_v12 = vsel %vm36_vm0, %v62_v3, inf }
  0x18   :  { %59 = vmax.xlane.f32.xlu2 %v58_v10 }
  0x1e   :  { %v70_v4 = vld.sshfl [vmem:[#allocation1 + $0x8] sm:$0xff pattern:$0x75316420] }
  0x1f   :  { %71 = vrot.lane.b32.xlu0 %v70_v4, %s307_s0  ;;  %77 = vst [vmem:[#allocation1] ss:$2 sm:$0xff] %v347_v0 }
  0x20   :  { %65 = vmin.xlane.f32.xlu2 %v64_v12 }
  0x26   :  { %v78_v5 = vld.sshfl [vmem:[#allocation1 + $0x8] sm:$0xff pattern:$0x75316420] }
  0x27   :  { %79 = vrot.lane.b32.xlu0 %v78_v5, %s307_s0  ;;  %104 = vst [vmem:[#allocation1] ss:$2 sm:$0xff] %v350_v1  ;;  %v308_v5 = vmov 0  }
  0x28   :  { %88 = vmax.xlane.f32.xlu2 %v87_v15  ;;  %249 = vset.pattern.permute.xlu0 %v308_v5 }
  0x29   :  { %248 = vset.pattern.permute.xlu2 %v308_v5 }
  0x2e   :  { %v105_v7 = vld.sshfl [vmem:[#allocation1 + $0x8] sm:$0xff pattern:$0x75316420] }
  0x2f   :  { %110 = vst [vmem:[#allocation1] ss:$2 sm:$0xff] %v350_v1  ;;  %v107_v17 = vsel %vm36_vm0, %v105_v7, -inf }
  0x30   :  { %91 = vmin.xlane.f32.xlu2 %v90_v16 }
  0x36   :  { %v111_v9 = vld.sshfl [vmem:[#allocation1 + $0x8] sm:$0xff pattern:$0x75316420] }
  0x37   :  { %118 = vst [vmem:[#allocation1] ss:$2 sm:$0xff] %v350_v1  ;;  %v113_v21 = vsel %vm36_vm0, %v111_v9, inf }
  0x38   :  { %108 = vmax.xlane.f32.xlu2 %v107_v17 }
  0x3e   :  { %v119_v11 = vld.sshfl [vmem:[#allocation1 + $0x8] sm:$0xff pattern:$0x75316420] }
  0x3f   :  { %120 = vrot.lane.b32.xlu1 %v119_v11, %s307_s0  ;;  %126 = vst [vmem:[#allocation1] ss:$2 sm:$0xff] %v350_v1 }
  0x46   :  { %v127_v13 = vld.sshfl [vmem:[#allocation1 + $0x8] sm:$0xff pattern:$0x75316420] }
  0x47   :  { %128 = vrot.lane.b32.xlu1 %v127_v13, %s307_s0  ;;  %138 = vst [vmem:[#allocation1] ss:$2 sm:$0xff] %v347_v0 }
  0x4e   :  { %v139_v26 = vld.sshfl [vmem:[#allocation1] sm:$0xff pattern:$0x75316420]  ;;  %v140_v27 = vld.sshfl [vmem:[#allocation1 + $0x8] sm:$0xff pattern:$0x75316420] }
  0x4f   :  { %v150_v28 = vsel %vm149_vm2, %v139_v26, 0.0  ;;  %v151_v29 = vsel %vm149_vm2, %v140_v27, 0.0  ;;  %v182_v27 = vld [vmem:[%s410_s1] sm:$0xf]  ;;  %s310_s1 = smov [#allocation5]  }
  0x50   :  { %v152_v30 = vadd.f32 %v151_v29, %v150_v28 }
  0x51   :  { %47 = vmax.xlane.f32.xlu0 %v46_v14 }
  0x59   :  { %96 = vmax.xlane.f32.xlu0 %v95_v19 }
  0x61   :  { %114 = vmin.xlane.f32.xlu0 %v113_v21 }
  0x69   :  { %153 = vadd.xlane.f32.xlu0 %v152_v30 }
  0x71   :  { %50 = vmin.xlane.f32.xlu1 %v49_v18 }
  0x79   :  { %99 = vmin.xlane.f32.xlu1 %v98_v20 }
  0x7b   :  { %v39_v40 = vpop.xlane.xlu2 %38 }
  0x83   :  { %v42_v41 = vpop.xlane.xlu2 %41 }
  0x8b   :  { %v60_v42 = vpop.xlane.xlu2 %59 }
  0x91   :  { %v72_v22 = vpop.permute.xlu0 %71 }
  0x92   :  { %v74_v23 = vsel %vm36_vm0, %v72_v22, -inf }
  0x93   :  { %75 = vmax.xlane.f32.xlu2 %v74_v23  ;;  %v66_v43 = vpop.xlane.xlu2 %65 }
  0x99   :  { %v80_v24 = vpop.permute.xlu0 %79 }
  0x9a   :  { %v82_v25 = vsel %vm36_vm0, %v80_v24, inf }
  0x9b   :  { %83 = vmin.xlane.f32.xlu2 %v82_v25  ;;  %v89_v44 = vpop.xlane.xlu2 %88 }
  0xa3   :  { %v92_v45 = vpop.xlane.xlu2 %91 }
  0xab   :  { %v109_v46 = vpop.xlane.xlu2 %108 }
  0xb1   :  { %v121_v31 = vpop.permute.xlu1 %120 }
  0xb2   :  { %v123_v34 = vsel %vm36_vm0, %v121_v31, -inf }
  0xb3   :  { %124 = vmax.xlane.f32.xlu1 %v123_v34 }
  0xb9   :  { %v129_v38 = vpop.permute.xlu1 %128 }
  0xba   :  { %v131_v39 = vsel %vm36_vm0, %v129_v38, inf }
  0xbb   :  { %132 = vmin.xlane.f32.xlu2 %v131_v39  ;;  %158 = vadd.xlane.f32.xlu1 %v157_v37  ;;  %v193_v37 = vunpack.c.0.s8 %v192_v36 }
  0xc4   :  { %v48_v47 = vpop.xlane.xlu0 %47 }
  0xc5   :  { %v52_v50 = vadd.f32 %v48_v47, %v39_v40 }
  0xc7   :  { %v67_v53 = vadd.f32 %v60_v42, %v52_v50 }
  0xcc   :  { %v97_v51 = vpop.xlane.xlu0 %96 }
  0xd4   :  { %v115_v59 = vpop.xlane.xlu0 %114 }
  0xdc   :  { %v154_v3 = vpop.xlane.xlu0 %153 }
  0xdd   :  { %v160_v8 = vsel %vm149_vm2, %v154_v3, 0.0 }
  0xe4   :  { %v51_v49 = vpop.xlane.xlu1 %50 }
  0xe5   :  { %v53_v52 = vadd.f32 %v51_v49, %v42_v41 }
  0xe7   :  { %v68_v57 = vadd.f32 %v66_v43, %v53_v52 }
  0xec   :  { %v100_v55 = vpop.xlane.xlu1 %99 }
 0x106   :  { %v76_v48 = vpop.xlane.xlu2 %75 }
 0x107   :  { %v85_v56 = vadd.f32 %v76_v48, %v67_v53 }
 0x109   :  { %v93_v60 = vadd.f32 %v89_v44, %v85_v56 }
 0x10b   :  { %v101_v63 = vadd.f32 %v97_v51, %v93_v60 }
 0x10d   :  { %v116_v4 = vadd.f32 %v109_v46, %v101_v63 }
 0x10e   :  { %v84_v54 = vpop.xlane.xlu2 %83 }
 0x10f   :  { %v86_v58 = vadd.f32 %v84_v54, %v68_v57 }
 0x111   :  { %v94_v61 = vadd.f32 %v92_v45, %v86_v58 }
 0x113   :  { %v102_v2 = vadd.f32 %v100_v55, %v94_v61 }
 0x115   :  { %v117_v6 = vadd.f32 %v115_v59, %v102_v2 }
 0x126   :  { %v125_v62 = vpop.xlane.xlu1 %124 }
 0x127   :  { %v134_v7 = vadd.f32 %v125_v62, %v116_v4 }
 0x129   :  { %v136_v14 = vmul.f32 0.125, %v134_v7 }
 0x12e   :  { %v133_v9 = vpop.xlane.xlu2 %132  ;;  %v159_v10 = vpop.xlane.xlu1 %158 }
 0x12f   :  { %v135_v11 = vadd.f32 %v133_v9, %v117_v6  ;;  %v161_v12 = vsel %vm149_vm2, %v159_v10, 0.0 }
 0x130   :  { %v162_v13 = vadd.f32 %v161_v12, %v160_v8 }
 0x131   :  { %v137_v15 = vmul.f32 0.125, %v135_v11 }
 0x132   :  { %v163_v16 = vmul.f32 0.001953125, %v162_v13 }
 0x133   :  { %v164_v17 = vsub.f32 %v136_v14, %v137_v15 }
 0x134   :  { %212 = vst.msk [vmem:[%s413_s4] sm:$0xf] %vm211_vm3, %v163_v16 }
 0x135   :  { %v165_v18 = vmul.f32 0.34673417, %v164_v17 }
 0x137   :  { %v166_v19 = vadd.f32 1e-05, %v165_v18 }
 0x139   :  { %250 = vrcp.f32 %v166_v19  ;;  %v178_v23 = vand.u32 2147483648, %v166_v19  ;;  %v176_v25 = vand.u32 2147483647, %v166_v19  ;;  %vm172_vm5 = vweird.f32 %v166_v19 }
 0x13b   :  { %v179_v28 = vor.u32 1.1754944e-38, %v178_v23  ;;  %vm177_vm7 = vcmp.eq.f32.partialorder %v176_v25, 8.507059e+37 }
 0x13f   :  { %v251_v20 = vpop.eup %250 }
 0x140   :  { %v168_v21 = vmul.f32 %v251_v20, %v166_v19  ;;  %vm173_vm4 = vweird.f32 %v251_v20 }
 0x141   :  { %vm174_vm6 = vmor %vm172_vm5, %vm173_vm4 }
 0x142   :  { %v169_v22 = vsub.f32 1.0, %v168_v21 }
 0x144   :  { %v170_v24 = vmul.f32 %v251_v20, %v169_v22 }
 0x146   :  { %v171_v26 = vadd.f32 %v251_v20, %v170_v24 }
 0x148   :  { %v175_v29 = vsel %vm174_vm6, %v251_v20, %v171_v26 }
 0x149   :  { %v180_v30 = vsel %vm177_vm7, %v179_v28, %v175_v29 }
 0x14a   :  { %v184_v31 = vmul.f32 %v182_v27, %v180_v30  ;;  %213 = vst.msk [vmem:[%s414_s5] sm:$0xf] %vm211_vm3, %v180_v30  ;;  %s218_s5 = sshll.u32 %s310_s1, 4  ;;  %s219_s5 = int_to_ptr.vmem [resolvable:$true] %s218_s5 }
 0x14c   :  { %v185_v33 = vmul.f32 %v184_v31, %v163_v16  ;;  %189 = vperm.xlu2 %248, %v184_v31  }
 0x14e   :  { %v186_v34 = vsub.f32 %v183_v32, %v185_v33 }
 0x150   :  { %200 = vperm.xlu0 %249, %v186_v34  }
 0x1a6   :  { %v190_v38 = vpop.permute.xlu2 %189 }
 0x1a7   :  { %v194_v39 = vperm.slane %v190_v38, %v193_v37 }
 0x1a9   :  { %v196_v41 = vmul.f32 %v194_v39, %v347_v0  ;;  %v197_v42 = vmul.f32 %v194_v39, %v350_v1 }
 0x1c2   :  { %v201_v40 = vpop.permute.xlu0 %200 }
 0x1c3   :  { %v205_v43 = vperm.slane %v201_v40, %v193_v37 }
 0x1c5   :  { %v207_v44 = vadd.f32 %v205_v43, %v196_v41  ;;  %v208_v45 = vadd.f32 %v205_v43, %v197_v42 }
 0x1c7   :  { %209 = vst [vmem:[#allocation5] sm:$0xff] %v207_v44 }
 0x1c8   :  { %210 = vst [vmem:[#allocation5 + $0x8] sm:$0xff] %v208_v45 }
 0x1c9   :  { %226 = dma.vmem_to_hbm [thread:$0]  %s219_s5, 256, %s221_s2, [#allocation4], %s305_s23, %s305_s23, %s306_s24  }
 0x1ca   :  { %302 = dma.done.wait [#allocation4], 256  }
 0x1cb   :  { %303 = vsyncadd [#allocation4], 4294967040 }
 0x1cc   :  { %239 = vsyncpa [#allocation3], 1 }
 0x1cd   :  { %240 = vsyncpa [#allocation4], 1 }

</bundles_post_ra>
